<compile_context>
chip_gen: v5e
topology: v5e:2x2
jax: 0.10.0
libtpu: 0.0.40
codegen_flags: <defaults>
</compile_context>

<pallas_src>
import functools

import jax
import jax.numpy as jnp
from jax.experimental import pallas as pl
from jax.experimental.pallas import tpu as pltpu


def _round_up(x, m):
    return -(-x // m) * m


def _channels_pool_kernel(x_ref, o_ref, *, c_out, ksize, stride, mode):
    """Pool along the channel axis for one (batch, lane-tile) block.

    stride == 1 : x_ref block is (1, C, T)       -> windows are contiguous rows.
    stride >= 2 : x_ref block is (1, m, s, T)    -> window offset j = q*s + r
                  lives at rows [q, q+c_out) of group-phase r.
    All reads are static, unit-stride slices (no strided ref indexing), and the
    result is written with ONE dense full-block store.
    """
    def window(j):
        if stride == 1:
            return x_ref[0, pl.ds(j, c_out), :]          # (C_out, T)
        q, r = divmod(j, stride)
        return x_ref[0, pl.ds(q, c_out), r, :]           # (C_out, T)

    if mode == "max":
        acc = window(0)
        for j in range(1, ksize):
            acc = jnp.maximum(acc, window(j))
        o_ref[0, :, :] = acc.astype(o_ref.dtype)
    else:  # avg — accumulate in f32, cast once at the store
        acc = window(0).astype(jnp.float32)
        for j in range(1, ksize):
            acc = acc + window(j).astype(jnp.float32)
        o_ref[0, :, :] = (acc * (1.0 / ksize)).astype(o_ref.dtype)


def channels_pool(x, kernel_size=2, stride=None, mode="max"):
    """Pallas implementation of ChannelsPool(nn.MaxPool1d/AvgPool1d)(x).

    x: [N, C, H, W]  ->  [N, C_out, H, W],  C_out = (C - kernel_size)//stride + 1
    """
    if stride is None:
        stride = kernel_size
    assert mode in ("max", "avg")

    n, c, h, w = x.shape
    hw = h * w
    c_out = (c - kernel_size) // stride + 1
    assert c_out >= 1

    itemsize = jnp.dtype(x.dtype).itemsize

    # ---- lane axis: flatten HxW and pad to a multiple of 128 so stores stay
    #      lane-dense; padded lanes are dropped after the call.
    hw_pad = _round_up(hw, 128)
    x3 = x.reshape(n, c, hw)
    if hw_pad != hw:
        x3 = jnp.pad(x3, ((0, 0), (0, 0), (0, hw_pad - hw)))

    # ---- channel axis: fold the strided window selection into a free reshape.
    if stride == 1:
        x_in = x3
        in_rows_real = c
        in_rows_vmem = _round_up(c, 8)
        in_block = lambda t: (1, c, t)
        in_index = lambda b, si: (b, 0, si)
    else:
        q_max = (kernel_size - 1) // stride          # max group offset inside a window
        m = c_out + q_max                            # number of stride-groups needed
        c_need = m * stride
        if c_need <= c:
            x_in = x3[:, :c_need, :]
        else:                                        # < stride rows of never-read padding
            x_in = jnp.pad(x3, ((0, 0), (0, c_need - c), (0, 0)))
        x_in = x_in.reshape(n, m, stride, hw_pad)    # pure view of the channel slab
        in_rows_real = c_need
        in_rows_vmem = m * _round_up(stride, 8)      # VMEM pads the s dim to 8 sublanes
        in_block = lambda t: (1, m, stride, t)
        in_index = lambda b, si: (b, 0, 0, si)

    out_rows_vmem = _round_up(c_out, 8)

    # ---- generation-aware VMEM / tile budget.
    vmem_cap = 128 << 20                             # v5e/v6e physical; fallback
    try:
        vmem_cap = int(pltpu.get_tpu_info().vmem_capacity_bytes)   # 64 MiB on v7x
    except Exception:
        pass
    pipeline_budget = min(vmem_cap // 4, 24 << 20)   # double-buffered in+out budget
    target_in_bytes = 4 << 20                        # roofline-friendly input block

    lane_units = hw_pad // 128
    bytes_per_lane = (in_rows_vmem + out_rows_vmem) * itemsize
    t_budget = max(pipeline_budget // (2 * bytes_per_lane), 128)
    t_target = max(target_in_bytes // max(in_rows_real * itemsize, 1), 128)
    t_cap = max((min(t_budget, t_target) // 128) * 128, 128)

    n_lane_tiles = max(1, -(-hw_pad // t_cap))
    min_steps = 4                                    # keep both v7x TCs busy
    if n * n_lane_tiles < min_steps:
        n_lane_tiles = min(lane_units, -(-min_steps // n))
    units_per_tile = -(-lane_units // n_lane_tiles)
    t_hw = 128 * units_per_tile                      # multiple of 128 by construction
    n_s = -(-lane_units // units_per_tile)

    footprint = 2 * (in_rows_vmem + out_rows_vmem) * t_hw * itemsize
    vmem_limit = int(min(vmem_cap - (8 << 20), max(2 * footprint, 32 << 20)))
    vmem_limit = max(vmem_limit, footprint + (4 << 20))

    kernel = functools.partial(
        _channels_pool_kernel,
        c_out=c_out, ksize=kernel_size, stride=stride, mode=mode,
    )

    cost = pl.CostEstimate(
        flops=max(kernel_size - 1, 0) * c_out * n * hw,
        transcendentals=0,
        bytes_accessed=(in_rows_real + c_out) * n * hw_pad * itemsize,
    )

    y3 = pl.pallas_call(
        kernel,
        out_shape=jax.ShapeDtypeStruct((n, c_out, hw_pad), x.dtype),
        grid_spec=pltpu.PrefetchScalarGridSpec(
            num_scalar_prefetch=0,
            grid=(n, n_s),
            in_specs=[pl.BlockSpec(in_block(t_hw), in_index)],
            out_specs=pl.BlockSpec((1, c_out, t_hw), lambda b, si: (b, 0, si)),
        ),
        compiler_params=pltpu.CompilerParams(
            dimension_semantics=("parallel", "parallel"),
            vmem_limit_bytes=vmem_limit,
        ),
        cost_estimate=cost,
    )(x_in)

    if hw_pad != hw:
        y3 = y3[:, :, :hw]
    return y3.reshape(n, c_out, h, w)


def _reference(x, kernel_size, stride, mode):
    # Pure-JAX reference of the PyTorch forward (no padding, no dilation).
    n, c, h, w = x.shape
    c_out = (c - kernel_size) // stride + 1
    windows = jnp.stack(
        [x[:, co * stride:co * stride + kernel_size] for co in range(c_out)],
        axis=1,
    )  # [N, C_out, k, H, W]
    if mode == "max":
        return windows.max(axis=2)
    return windows.mean(axis=2)


if __name__ == "__main__":
    key = jax.random.PRNGKey(0)
    # ChannelsPool(nn.MaxPool1d(2, 2)) on x of shape [2, 8, 16, 16] -> [2, 4, 16, 16]
    N, C, H, W = 2, 8, 16, 16
    x = jax.random.uniform(key, (N, C, H, W), dtype=jnp.float32)

    # Max-pool over channels (the docstring example).
    y_max = channels_pool(x, kernel_size=2, stride=2, mode="max")
    jax.block_until_ready(y_max)
    ref_max = _reference(x, 2, 2, "max")
    assert y_max.shape == (N, C // 2, H, W)
    assert jnp.allclose(y_max, ref_max, atol=1e-6), "max pool mismatch"

    # AvgPool1d variant the module also accepts.
    y_avg = channels_pool(x, kernel_size=2, stride=2, mode="avg")
    jax.block_until_ready(y_avg)
    assert jnp.allclose(y_avg, _reference(x, 2, 2, "avg"), atol=1e-6), "avg pool mismatch"

    # Overlapping windows (stride != kernel_size) -> exercises the grouped 4-D path.
    y_ov = channels_pool(x, kernel_size=3, stride=2, mode="max")
    jax.block_until_ready(y_ov)
    ref_ov = _reference(x, 3, 2, "max")
    assert y_ov.shape == ref_ov.shape
    assert jnp.allclose(y_ov, ref_ov, atol=1e-6), "overlapping max pool mismatch"

    # stride == 1 path (contiguous windows, 3-D blocks).
    y_s1 = channels_pool(x, kernel_size=2, stride=1, mode="max")
    jax.block_until_ready(y_s1)
    assert jnp.allclose(y_s1, _reference(x, 2, 1, "max"), atol=1e-6), "stride-1 mismatch"

    # H*W not a multiple of 128 -> exercises lane padding + post-slice.
    x2 = jax.random.uniform(jax.random.PRNGKey(1), (1, 8, 6, 6), dtype=jnp.float32)
    y_p = channels_pool(x2, kernel_size=2, stride=2, mode="max")
    jax.block_until_ready(y_p)
    assert jnp.allclose(y_p, _reference(x2, 2, 2, "max"), atol=1e-6), "lane-pad mismatch"

    print("KERNEL_OK")
</pallas_src>

<mosaic_0001>
module attributes {stable_mosaic.version = 11 : i64} {
  func.func @_channels_pool_kernel(%arg0: i32, %arg1: i32, %arg2: memref<1x4x2x128xf32, #tpu.memory_space<vmem>>, %arg3: memref<1x4x128xf32, #tpu.memory_space<vmem>>) attributes {dimension_semantics = [#tpu.dimension_semantics<parallel>, #tpu.dimension_semantics<parallel>], iteration_bounds = array<i64: 2, 2>, scalar_prefetch = 0 : i64, scratch_operands = 0 : i64, tpu.core_type = #tpu.core_type<tc>, window_params = [{transform_indices = @transform_0, window_bounds = array<i64: 1, 4, 2, 128>}, {transform_indices = @transform_1, window_bounds = array<i64: 1, 4, 128>}]} {
    %c0 = arith.constant 0 : index
    %c0_0 = arith.constant 0 : index
    %c0_1 = arith.constant 0 : index
    %c0_2 = arith.constant 0 : index
    %0 = vector.load %arg2[%c0, %c0_0, %c0_1, %c0_2] : memref<1x4x2x128xf32, #tpu.memory_space<vmem>>, vector<1x4x1x128xf32>
    %1 = vector.shape_cast %0 : vector<1x4x1x128xf32> to vector<4x128xf32>
    %c0_3 = arith.constant 0 : index
    %c0_4 = arith.constant 0 : index
    %c1 = arith.constant 1 : index
    %c0_5 = arith.constant 0 : index
    %2 = vector.load %arg2[%c0_3, %c0_4, %c1, %c0_5] : memref<1x4x2x128xf32, #tpu.memory_space<vmem>>, vector<1x4x1x128xf32>
    %3 = vector.shape_cast %2 : vector<1x4x1x128xf32> to vector<4x128xf32>
    %4 = arith.maximumf %1, %3 : vector<4x128xf32>
    %c0_6 = arith.constant 0 : index
    %c0_7 = arith.constant 0 : index
    %c0_8 = arith.constant 0 : index
    %5 = vector.load %arg3[%c0_6, %c0_7, %c0_8] : memref<1x4x128xf32, #tpu.memory_space<vmem>>, vector<1x4x128xf32>
    %6 = vector.shape_cast %5 : vector<1x4x128xf32> to vector<4x128xf32>
    %7 = vector.shape_cast %4 : vector<4x128xf32> to vector<1x4x128xf32>
    tpu.vector_store %arg3[%c0_6, %c0_7, %c0_8], %7 {strides = array<i32>} : memref<1x4x128xf32, #tpu.memory_space<vmem>>, vector<1x4x128xf32>,
    return
  }
  func.func @transform_0(%arg0: i32, %arg1: i32) -> (i32, i32, i32, i32) {
    %c0_i32 = arith.constant 0 : i32
    %c0_i32_0 = arith.constant 0 : i32
    %c0_i32_1 = arith.constant 0 : i32
    return %arg0, %c0_i32, %c0_i32_0, %arg1 : i32, i32, i32, i32
  }
  func.func @transform_1(%arg0: i32, %arg1: i32) -> (i32, i32, i32) {
    %c0_i32 = arith.constant 0 : i32
    %c0_i32_0 = arith.constant 0 : i32
    return %arg0, %c0_i32, %arg1 : i32, i32, i32
  }
}

</mosaic_0001>

<bundles_post_ra>
// kernel: tpu_custom_call.1
= control target key start
LH: loop header
LB: loop body
LE: loop exit
PB: predicated region body
PF: predicated region fallthrough
CT: control target
= control target key end

     0   :  { %6 = vsyncpa [#allocation3], 0  ;;  %s666_s0 = inlined_call_operand.hbm [shape: f32[2,4,2,256], index: 0, kind: input, shape index: {}]   ;;  %s667_s1 = inlined_call_operand.hbm [shape: f32[2,4,256], index: 1, kind: output, shape index: {}]  }
   0x1   :  { %8 = vsyncpa [#allocation3 + $0x1], 0 }
   0x2   :  { %9 = vsyncpa [#allocation4], 0 }
   0x3   :  { %11 = vsyncpa [#allocation4 + $0x1], 0  ;;  %s523_s6 = smov 0   ;;  %s525_s7 = smov 0  }
   0x4   :  { %s527_s8 = smov 0   ;;  %s529_s9 = smov 0  }
   0x5   :  { %s531_s10 = smov 0   ;;  %s533_s11 = smov 0  }
   0x6   :  { %s535_s12 = smov 0   ;;  %s537_s13 = smov 0  }
   0x7 LB: > { %s284_s14 = sadd.s32 4294967295, %s508_s13   ;;  %s285_s15 = sadd.s32 4294967294, %s508_s13   ;;  %s508_s13 = sphi %s537_s13, %s17_s13   ;;  %s504_s12 = sphi %s535_s12, %s681_s12   ;;  %s500_s11 = sphi %s533_s11, %s680_s11   ;;  %s496_s10 = sphi %s531_s10, %s679_s10   ;;  %s492_s9 = sphi %s529_s9, %s678_s9   ;;  %s488_s8 = sphi %s527_s8, %s677_s8   ;;  %s484_s7 = sphi %s525_s7, %s676_s7   ;;  %s480_s6 = sphi %s523_s6, %s675_s6  }
   0x8   : > { %s26_s16 = sadd.s32 1, %s500_s11  ;;  %s29_s17 = sadd.s32 1, %s504_s12 }
   0x9   : > { %p27_p0 = scmp.ge.s32.totalorder %s26_s16, 2  ;;  %s38_s18 = sadd.s32 1, %s488_s8 }
   0xa   : > { %p45_p1 = scmp.ne.s32.totalorder %s488_s8, %s484_s7  ;;  %p46_p2 = scmp.eq.s32.totalorder %s508_s13, 0 }
   0xb   : > { %s683_s16 = smov (%p27_p0, %s26_s16), 0  ;;  %s685_s17 = smov (!%p27_p0, %s29_s17), %s504_s12 }
   0xc   : > { %s34_s19 = ssub.s32 %s500_s11, %s683_s16  ;;  %p576_p3 = por %p46_p2, %p45_p1 }
   0xd   : > { %p31_p4 = scmp.ge.s32.totalorder %s685_s17, 2  ;;  %p51_p5 = scmp.ne.s32.totalorder %s484_s7, %s480_s6 }
   0xe   : > { %p52_p6 = scmp.eq.s32.totalorder %s284_s14, 0  ;;  %p77_p7 = scmp.eq.s32.totalorder %s284_s14, 3 }
   0xf   : > { %s687_s17 = smov (%p31_p4, %s685_s17), 0  ;;  %p83_p10 = scmp.eq.s32.totalorder %s285_s15, 3 }
  0x10   : > { %670 = sst [smem:[#allocation8_spill]] %s687_s17  ;;  %p584_p8 = por %p52_p6, %p51_p5 }
  0x11   : > { %p588_p9 = por %p77_p7, %p45_p1  ;;  %s33_s23 = ssub.s32 %s504_s12, %s687_s17 }
  0x12   : > { %s35_s24 = sor.u32 %s34_s19, %s33_s23  ;;  %p594_p12 = por %p83_p10, %p51_p5 }
  0x13   : > { %p36_p11 = scmp.eq.s32.totalorder %s35_s24, 0  ;;  %p311_p13 = scmp.lt.s32.totalorder %s508_s13, 4 }
  0x14   : > { %s103_s26 = sand.u32 1, %s488_s8   ;;  %s289_s29 = sshll.u32 %s504_s12, 3 }
  0x15   : > { %s601_s27 = scalar_select %p36_p11, %s488_s8, %s38_s18  }
  0x16   : > { %s288_s28 = sshll.u32 %s103_s26, 3  ;;  %s111_s30 = sadd.s32 %s500_s11, %s289_s29 }
  0x17   : > { %s107_s2 = scalar_lea.vmem [#allocation2], %s288_s28  ;;  %s290_s4 = sshll.u32 %s111_s30, 1 }
  0x18   : > { %s116_s3 = sshll.u32 %s107_s2, 4  ;;  %s113_s15 = scalar_lea.hbm %s666_s0, %s290_s4  ;;  %s117_s3 = int_to_ptr.vmem [resolvable:$true] %s116_s3 }
  0x19   : > { %p304_p0 = pnand %p311_p13, %p576_p3  ;;  %s114_s19 = sshll.u32 %s113_s15, 4  ;;  %s115_s19 = int_to_ptr.hbm [resolvable:$true] %s114_s19 }
  0x1a   : > { %s104_s23 = scalar_lea.sflag [#allocation3], %s103_s26  ;;  %s510_s18 = smov 64  }
  0x1b   : > { %s511_s24 = smov 32   ;;  %s512_s17 = smov 2  }
  0x1c   : > { %306 = dma.hbm_to_vmem [thread:$0]  (!%p304_p0), %s115_s19, 128, %s117_s3, %s104_s23, %s510_s18, %s511_s24, %s512_s17  }
  0x1d   : > { %p291_p1 = scmp.ge.s32.totalorder %s508_s13, 1  ;;  %p124_p2 = scmp.lt.s32.totalorder %s508_s13, 5 }
  0x1f   : > { %p125_p4 = pnand %p291_p1, %p124_p2 }
  0x20   : > { %s613_s28 = sand.u32 (!%p125_p4), 1, %s484_s7  }
  0x21   : > { %128 = sbr.rel (%p125_p4) target bundleno = 56 (0x38), region = 24  ;;  %s292_s29 = sshll.u32 (!%p125_p4), %s613_s28, 3 }
  0x22   : > { %s131_s20 = scalar_lea.sflag (!%p125_p4), [#allocation3], %s613_s28  ;;  %s134_s30 = scalar_lea.vmem (!%p125_p4), [#allocation2], %s292_s29 }
  0x26   : > { %471 = dma.done.wait (%p584_p8), %s131_s20, 128  }
  0x27   : > { %473 = vsyncadd (%p584_p8), %s131_s20, 4294967168  ;;  %s295_s17 = sshll.u32 %s496_s10, 1  ;;  %s293_s2 = sshll.u32 %s613_s28, 2  ;;  %v154_v0 = vld [vmem:[%s134_s30] sm:$0x1]  ;;  %vm171_vm0 = vcmask 1041409  }
  0x28   : > { %s192_s26 = sadd.s32 %s492_s9, %s295_s17  ;;  %v155_v1 = vld [vmem:[%s134_s30 + $0x2] sm:$0x1]  ;;  %v156_v2 = vld [vmem:[%s134_s30 + $0x4] sm:$0x1]  ;;  %v157_v3 = vld [vmem:[%s134_s30 + $0x6] sm:$0x1] }
  0x29   : > { %s296_s3 = sshll.u32 %s192_s26, 2  ;;  %v158_v4 = vld [vmem:[%s134_s30 + $0x1] sm:$0x1]  ;;  %v159_v5 = vld [vmem:[%s134_s30 + $0x3] sm:$0x1]  ;;  %vm174_vm1 = vcmask 1042434  }
  0x2a   : > { %s194_s14 = scalar_lea.hbm %s667_s1, %s296_s3  ;;  %v160_v6 = vld [vmem:[%s134_s30 + $0x5] sm:$0x1]  ;;  %v161_v7 = vld [vmem:[%s134_s30 + $0x7] sm:$0x1]  ;;  %v162_v8 = vmax.f32 %v154_v0, %v158_v4  ;;  %v163_v9 = vmax.f32 %v155_v1, %v159_v5  ;;  %s153_s9 = scalar_lea.vmem [#allocation5], %s293_s2  ;;  %vm177_vm2 = vcmask 1043459  }
  0x2b   : > { %v164_v10 = vmax.f32 %v156_v2, %v160_v6  ;;  %v165_v11 = vmax.f32 %v157_v3, %v161_v7  ;;  %s196_s10 = sshll.u32 %s153_s9, 4  ;;  %s198_s21 = sshll.u32 %s194_s14, 4  ;;  %s197_s10 = int_to_ptr.vmem [resolvable:$true] %s196_s10  ;;  %s199_s21 = int_to_ptr.hbm [resolvable:$true] %s198_s21 }
  0x2c   : > { %v170_v12 = vrot.slane %v163_v9, 7  ;;  %s182_s15 = scalar_lea.sflag [#allocation4], %s613_s28  ;;  %s424_s19 = sshra.s32 %s199_s21, 4  ;;  %s425_s19 = int_to_ptr.hbm [resolvable:$true] %s424_s19 }
  0x2d   : > { %v173_v13 = vrot.slane %v164_v10, 6  ;;  %v176_v14 = vrot.slane %v165_v11, 5  ;;  %s426_s23 = scalar_lea.hbm %s425_s19, 4  ;;  %s430_s29 = scalar_lea.hbm %s667_s1, 16 }
  0x2e   : > { %v172_v15 = vsel %vm171_vm0, %v170_v12, %v162_v8  ;;  %p427_p3 = scmp.ne.s32.totalorder %s425_s19, %s426_s23  ;;  %p431_p7 = scmp.lt.s32.totalorder %s425_s19, %s667_s1 }
  0x2f   : > { %v175_v16 = vsel %vm174_vm1, %v173_v13, %v172_v15  ;;  %p432_p8 = scmp.lt.s32.totalorder %s430_s29, %s426_s23 }
  0x30   : > { %v178_v17 = vsel %vm177_vm2, %v176_v14, %v175_v16  ;;  %p428_p5 = pnand %p427_p3, %p588_p9 }
  0x31   : > { %180 = vst [vmem:[%s153_s9] sm:$0xf] %v178_v17  ;;  %p433_p10 = por %p432_p8, %p431_p7 }
  0x32   : > { %p429_p6 = pneg %p428_p5 }
  0x34   : > { %p434_p11 = pnand %p433_p10, %p429_p6 }
  0x36   : > { %437 = shalt.err (!%p434_p11)
}
  0x37   : > { %301 = dma.vmem_to_hbm [thread:$0]  (%p588_p9), %s197_s10, 64, %s199_s21, %s182_s15  }
  0x38 PF: > { %p312_p13 = scmp.ge.s32.totalorder %s508_s13, 2  ;;  %s210_s28 = sand.u32 1, %s480_s6  }
  0x39   : > { %s211_s17 = scalar_lea.sflag [#allocation4], %s210_s28 }
  0x3a   : > { %p308_p0 = pnand %p312_p13, %p594_p12 }
  0x3c   : > { %p309_p1 = pneg %p308_p0 }
  0x3e   : > { %475 = dma.done.wait (%p309_p1), %s211_s17, 64  }
  0x3f   : > { %477 = vsyncadd (%p309_p1), %s211_s17, 4294967232  ;;  %s17_s13 = sadd.s32 1, %s508_s13   ;;  %s674_s22 = sld [smem:[#allocation8_spill]] }
  0x40   : > { %p14_p2 = scmp.ge.s32.totalorder %s17_s13, 6   ;;  %s675_s6 = smov %s484_s7 }
  0x41   : > { %s676_s7 = smov %s488_s8  ;;  %s677_s8 = smov %s601_s27 }
  0x42   : > { %s678_s9 = smov %s500_s11  ;;  %s679_s10 = smov %s504_s12 }
  0x43   : > { %s680_s11 = smov %s683_s16  ;;  %16 = sbr.rel (!%p14_p2) target bundleno = 7 (0x7), region = 69 }
  0x45   : > { %s681_s12 = smov %s674_s22 }
  0x48   :  { %217 = vsyncpa [#allocation3], 1 }
  0x49   :  { %219 = vsyncpa [#allocation3 + $0x1], 1 }
  0x4a   :  { %220 = vsyncpa [#allocation4], 1 }
  0x4b   :  { %222 = vsyncpa [#allocation4 + $0x1], 1 }

</bundles_post_ra>
